<compile_context>
chip_gen: v7x
topology: tpu7x:2x2x1
jax: 0.10.0
libtpu: 0.0.40
codegen_flags: <defaults>
</compile_context>

<pallas_src>
import functools
import math

import jax
import jax.numpy as jnp
from jax.experimental import pallas as pl
from jax.experimental.pallas import tpu as pltpu


def _round_up(x, m):
    return (x + m - 1) // m * m


def _vmem_limit(need_bytes):
    """Scoped-VMEM request: >=16 MiB, capped per-device (32 MiB on 64-MiB/TC parts)."""
    cap = 32 * 1024 * 1024
    try:
        vmem = pltpu.get_tpu_info().vmem_capacity_bytes
        cap = 48 * 1024 * 1024 if vmem >= 128 * 1024 * 1024 else 32 * 1024 * 1024
    except Exception:
        pass
    return int(min(cap, max(16 * 1024 * 1024, need_bytes)))


def _pick_tile(seq, min_rows, bytes_per_row, budget, cap=512):
    """Rows per seq-tile: amortize per-step overhead, stay inside the VMEM budget."""
    t = budget // max(bytes_per_row, 1)
    t = min(cap, t, _round_up(seq, min_rows))
    t = max(min_rows, (t // min_rows) * min_rows)
    return t


# ---------------------------------------------------------------------------
# Path A: small vocab -> table resident in VMEM, gather via one-hot MXU matmul.
# ---------------------------------------------------------------------------
def _embed_vmem_kernel(ids_ref, pos_ref, tab_ref, o_ref, *, scale):
    ids = ids_ref[...]                                   # (tile_s, 1) int32
    tile_s = ids.shape[0]
    vpad = tab_ref.shape[0]
    hot = jax.lax.broadcasted_iota(jnp.int32, (tile_s, vpad), 1) == ids
    rows = jnp.dot(hot.astype(tab_ref.dtype), tab_ref[...],
                   preferred_element_type=jnp.float32)
    o_ref[...] = (rows * scale + pos_ref[...]).astype(o_ref.dtype)


# ---------------------------------------------------------------------------
# Path B: large vocab -> manual HBM row gather, double-buffered across steps.
# ---------------------------------------------------------------------------
def _embed_gather_kernel(ids_ref, pos_ref, tok_hbm, o_ref, gbuf, sem, *, scale):
    t = pl.program_id(0)
    b = pl.program_id(1)
    n_b = pl.num_programs(1)
    n_steps = pl.num_programs(0) * n_b
    tile_s = gbuf.shape[1]

    step = t * n_b + b
    slot = step % 2

    def issue(bb, tt, sl):
        base = tt * tile_s

        def body(j, carry):
            tok = ids_ref[bb, base + j]
            pltpu.make_async_copy(tok_hbm.at[pl.ds(tok, 1)],
                                  gbuf.at[sl, pl.ds(j, 1)],
                                  sem.at[sl]).start()
            return carry

        jax.lax.fori_loop(0, tile_s, body, 0, unroll=8)

    # Prime the pipeline on the very first grid step.
    @pl.when(step == 0)
    def _():
        issue(b, t, slot)

    # Prefetch NEXT grid step's rows into the other slot before blocking on this
    # one, so their HBM latency overlaps this step's compute + writeback.
    @pl.when(step + 1 < n_steps)
    def _():
        nb = b + 1
        wrap = nb == n_b
        issue(jnp.where(wrap, 0, nb), t + wrap.astype(jnp.int32), 1 - slot)

    # ONE coalesced wait: its byte count equals the tile_s single-row copies
    # signalled on the same semaphore (DMA semaphores count bytes).
    pltpu.make_async_copy(tok_hbm.at[pl.ds(0, tile_s)], gbuf.at[slot],
                          sem.at[slot]).wait()

    o_ref[...] = (gbuf[slot].astype(jnp.float32) * scale
                  + pos_ref[...]).astype(o_ref.dtype)


def transformer_embedding(token_ids, tok_table, pos_table, *, scale=None,
                          vmem_budget_bytes=8 * 1024 * 1024,
                          small_table_bytes=4 * 1024 * 1024,
                          small_table_rows=4096,
                          force_hbm_gather=False):
    """out[b, s, :] = tok_table[token_ids[b, s], :] * scale + pos_table[s, :]"""
    B, S = token_ids.shape
    V, D = tok_table.shape
    assert pos_table.shape[1] == D and pos_table.shape[0] >= S
    # Lane-dense output slab: avoids masked vst.msk partial stores.
    assert D % 128 == 0, "d_model must be a multiple of 128 (TPU lane width)"
    scale = 1.0 if scale is None else float(scale)

    dtype = tok_table.dtype
    itemsize = jnp.dtype(dtype).itemsize
    min_rows = {4: 8, 2: 16, 1: 32}.get(itemsize, 8)     # sublane packing
    per_row_out = D * itemsize

    ids = token_ids.astype(jnp.int32)
    # PE kept in f32: it is streamed only once per kernel (see grid order), so
    # the extra bytes are negligible and the add matches an f32 reference.
    pos = pos_table[:S].astype(jnp.float32)

    v_pad = _round_up(V, 128)
    use_vmem_table = (not force_hbm_gather
                      and V <= small_table_rows
                      and v_pad * D * itemsize <= small_table_bytes)

    if use_vmem_table:
        # ---- Path A: VMEM-resident table + one-hot MXU gather --------------
        # live/row: 2x PE(f32) + 2x out + iota/one-hot intermediates.
        bytes_per_row = 2 * D * 4 + 2 * per_row_out + 2 * v_pad * 4
        tile_s = _pick_tile(S, min_rows, bytes_per_row, vmem_budget_bytes)
        S_pad = _round_up(S, tile_s)
        n_tiles = S_pad // tile_s

        if S_pad != S:                        # pad + slice, no divisibility assert
            ids = jnp.pad(ids, ((0, 0), (0, S_pad - S)))
            pos = jnp.pad(pos, ((0, S_pad - S), (0, 0)))
        ids3 = ids.reshape(B, S_pad, 1)

        tab = tok_table
        if v_pad != V:
            tab = jnp.pad(tab, ((0, v_pad - V), (0, 0)))

        need = (v_pad * D * itemsize + tile_s * bytes_per_row
                + 2 * tile_s * 128 * 4 + (2 << 20))

        out = pl.pallas_call(
            functools.partial(_embed_vmem_kernel, scale=scale),
            out_shape=jax.ShapeDtypeStruct((B, S_pad, D), dtype),
            grid_spec=pltpu.PrefetchScalarGridSpec(
                num_scalar_prefetch=0,
                # Seq-tiles outer, batch inner: PE block index (t, 0) and the
                # table block (0, 0) are unchanged across the inner batch loop,
                # so neither is re-DMA'd per batch element.
                grid=(n_tiles, B),
                in_specs=[
                    pl.BlockSpec((None, tile_s, 1), lambda t, b: (b, t, 0)),
                    pl.BlockSpec((tile_s, D), lambda t, b: (t, 0)),
                    pl.BlockSpec((v_pad, D), lambda t, b: (0, 0)),  # resident
                ],
                out_specs=pl.BlockSpec((None, tile_s, D),
                                       lambda t, b: (b, t, 0)),
            ),
            compiler_params=pltpu.CompilerParams(
                dimension_semantics=("parallel", "parallel"),
                vmem_limit_bytes=_vmem_limit(need),
            ),
        )(ids3, pos, tab)
        return out[:, :S, :]

    # ---- Path B: HBM row gather, double-buffered across grid steps ---------
    # live/row: 2-slot gather buffer + 2x PE(f32) + 2x out.
    bytes_per_row = 2 * per_row_out + 2 * D * 4 + 2 * per_row_out
    tile_s = _pick_tile(S, min_rows, bytes_per_row, vmem_budget_bytes)
    if V >= min_rows:
        # keep the coalesced-wait descriptor's dummy HBM source slice in bounds
        tile_s = min(tile_s, (V // min_rows) * min_rows)
    S_pad = _round_up(S, tile_s)
    n_tiles = S_pad // tile_s

    if S_pad != S:
        # Padded rows gather token 0 and are sliced off below.
        ids = jnp.pad(ids, ((0, 0), (0, S_pad - S)))
        pos = jnp.pad(pos, ((0, S_pad - S), (0, 0)))

    need = tile_s * bytes_per_row + (2 << 20)

    out = pl.pallas_call(
        functools.partial(_embed_gather_kernel, scale=scale),
        out_shape=jax.ShapeDtypeStruct((B, S_pad, D), dtype),
        grid_spec=pltpu.PrefetchScalarGridSpec(
            # Token ids land in SMEM as a 2-D (B, S_pad) table (no 1-D
            # next-pow2 padding blowup); needed to index the NEXT step's rows.
            num_scalar_prefetch=1,
            grid=(n_tiles, B),
            in_specs=[
                pl.BlockSpec((tile_s, D), lambda t, b, ids: (t, 0)),   # PE
                pl.BlockSpec(memory_space=pl.ANY),                     # table
            ],
            out_specs=pl.BlockSpec((None, tile_s, D),
                                   lambda t, b, ids: (b, t, 0)),
            scratch_shapes=[
                pltpu.VMEM((2, tile_s, D), dtype),       # double-buffered rows
                pltpu.SemaphoreType.DMA((2,)),           # one sem per slot
            ],
        ),
        compiler_params=pltpu.CompilerParams(
            # Cross-grid-step gather prefetch needs sequential step order.
            dimension_semantics=("arbitrary", "arbitrary"),
            vmem_limit_bytes=_vmem_limit(need),
        ),
    )(ids, pos, tok_table)
    return out[:, :S, :]


if __name__ == "__main__":
    key = jax.random.PRNGKey(0)
    k_ids, k_tab = jax.random.split(key)

    batch, seq, d_model, vocab, max_len = 2, 8, 128, 64, 16

    token_ids = jax.random.randint(k_ids, (batch, seq), 0, vocab,
                                   dtype=jnp.int32)
    tok_table = jax.random.normal(k_tab, (vocab, d_model),
                                  dtype=jnp.float32) * 0.02

    # Sinusoidal positional-encoding table (max_len >= seq).
    position = jnp.arange(max_len, dtype=jnp.float32)[:, None]
    dim2 = jnp.arange(0, d_model, 2, dtype=jnp.float32)[None, :]
    angles = position / jnp.power(10000.0, dim2 / d_model)
    pe = jnp.zeros((max_len, d_model), jnp.float32)
    pe = pe.at[:, 0::2].set(jnp.sin(angles))
    pe = pe.at[:, 1::2].set(jnp.cos(angles))

    scale = math.sqrt(d_model)   # Annotated-Transformer-style token scaling

    # Reference semantics: pos_embed(token_embed(x))
    ref = tok_table[token_ids] * scale + pe[None, :seq, :]

    # Path A (small vocab -> VMEM-resident table, one-hot MXU gather).
    out_fast = transformer_embedding(token_ids, tok_table, pe, scale=scale)
    out_fast = jax.block_until_ready(out_fast)
    assert out_fast.shape == (batch, seq, d_model)
    assert jnp.allclose(out_fast, ref, atol=1e-5, rtol=1e-5)

    # Path B (large-vocab HBM gather path, forced here to exercise it).
    out_gather = transformer_embedding(token_ids, tok_table, pe, scale=scale,
                                       force_hbm_gather=True)
    out_gather = jax.block_until_ready(out_gather)
    assert jnp.allclose(out_gather, ref, atol=1e-5, rtol=1e-5)

    print("KERNEL_OK")
</pallas_src>

<mosaic_0001>
module attributes {stable_mosaic.version = 11 : i64} {
  func.func @_embed_vmem_kernel(%arg0: i32, %arg1: i32, %arg2: memref<1x8x1xi32, #tpu.memory_space<vmem>>, %arg3: memref<8x128xf32, #tpu.memory_space<vmem>>, %arg4: memref<128x128xf32, #tpu.memory_space<vmem>>, %arg5: memref<1x8x128xf32, #tpu.memory_space<vmem>>) attributes {dimension_semantics = [#tpu.dimension_semantics<parallel>, #tpu.dimension_semantics<parallel>], iteration_bounds = array<i64: 1, 2>, scalar_prefetch = 0 : i64, scratch_operands = 0 : i64, tpu.core_type = #tpu.core_type<tc>, window_params = [{transform_indices = @transform_0, window_bounds = array<i64: 1, 8, 1>}, {transform_indices = @transform_1, window_bounds = array<i64: 8, 128>}, {pipeline_mode = #tpu.pipeline_mode<synchronous>, transform_indices = @transform_2, window_bounds = array<i64: 128, 128>}, {transform_indices = @transform_3, window_bounds = array<i64: 1, 8, 128>}]} {
    %c0 = arith.constant 0 : index
    %c0_0 = arith.constant 0 : index
    %c0_1 = arith.constant 0 : index
    %0 = vector.load %arg2[%c0, %c0_0, %c0_1] : memref<1x8x1xi32, #tpu.memory_space<vmem>>, vector<1x8x1xi32>
    %1 = vector.shape_cast %0 : vector<1x8x1xi32> to vector<8x1xi32>
    %2 = tpu.iota {dimensions = array<i32: 1>} : vector<8x128xi32>
    %3 = vector.broadcast %1 : vector<8x1xi32> to vector<8x128xi32>
    %4 = arith.cmpi eq, %2, %3 : vector<8x128xi32>
    %5 = arith.extui %4 : vector<8x128xi1> to vector<8x128xi32>
    %6 = arith.sitofp %5 : vector<8x128xi32> to vector<8x128xf32>
    %c0_2 = arith.constant 0 : index
    %c0_3 = arith.constant 0 : index
    %7 = vector.load %arg4[%c0_2, %c0_3] : memref<128x128xf32, #tpu.memory_space<vmem>>, vector<128x128xf32>
    %cst = arith.constant dense<0.000000e+00> : vector<8x128xf32>
    %8 = tpu.matmul %6, %7, %cst {dimension_numbers = #tpu.dot_dimension_numbers<[1], [0], [0], [1], [0, 0, 1, 1], [], []>} : vector<8x128xf32>, vector<128x128xf32>, vector<8x128xf32> -> vector<8x128xf32>
    %cst_4 = arith.constant 11.3137083 : f32
    %9 = vector.broadcast %cst_4 : f32 to vector<8x128xf32>
    %10 = arith.mulf %8, %9 : vector<8x128xf32>
    %c0_5 = arith.constant 0 : index
    %c0_6 = arith.constant 0 : index
    %11 = vector.load %arg3[%c0_5, %c0_6] : memref<8x128xf32, #tpu.memory_space<vmem>>, vector<8x128xf32>
    %12 = arith.addf %10, %11 : vector<8x128xf32>
    %c0_7 = arith.constant 0 : index
    %c0_8 = arith.constant 0 : index
    %c0_9 = arith.constant 0 : index
    %13 = vector.load %arg5[%c0_7, %c0_8, %c0_9] : memref<1x8x128xf32, #tpu.memory_space<vmem>>, vector<1x8x128xf32>
    %14 = vector.shape_cast %13 : vector<1x8x128xf32> to vector<8x128xf32>
    %15 = vector.shape_cast %12 : vector<8x128xf32> to vector<1x8x128xf32>
    tpu.vector_store %arg5[%c0_7, %c0_8, %c0_9], %15 {strides = array<i32>} : memref<1x8x128xf32, #tpu.memory_space<vmem>>, vector<1x8x128xf32>,
    return
  }
  func.func @transform_0(%arg0: i32, %arg1: i32) -> (i32, i32, i32) {
    %c0_i32 = arith.constant 0 : i32
    %c0_i32_0 = arith.constant 0 : i32
    return %arg1, %arg0, %c0_i32 : i32, i32, i32
  }
  func.func @transform_1(%arg0: i32, %arg1: i32) -> (i32, i32) {
    %c0_i32 = arith.constant 0 : i32
    %c0_i32_0 = arith.constant 0 : i32
    return %arg0, %c0_i32 : i32, i32
  }
  func.func @transform_2(%arg0: i32, %arg1: i32) -> (i32, i32) {
    %c0_i32 = arith.constant 0 : i32
    %c0_i32_0 = arith.constant 0 : i32
    %c0_i32_1 = arith.constant 0 : i32
    return %c0_i32, %c0_i32_0 : i32, i32
  }
  func.func @transform_3(%arg0: i32, %arg1: i32) -> (i32, i32, i32) {
    %c0_i32 = arith.constant 0 : i32
    %c0_i32_0 = arith.constant 0 : i32
    return %arg1, %arg0, %c0_i32 : i32, i32, i32
  }
}

</mosaic_0001>

<bundles_post_ra>
// kernel: tpu_custom_call.1
= control target key start
LH: loop header
LB: loop body
LE: loop exit
PB: predicated region body
PF: predicated region fallthrough
CT: control target
= control target key end

     0   :  { %8 = vsyncpa [#allocation3], 0  ;;  %s895_s0 = inlined_call_operand.vmem [shape: s32[2,8,1], index: 0, kind: input, shape index: {}]   ;;  %s896_s1 = inlined_call_operand.vmem [shape: f32[8,128], index: 1, kind: input, shape index: {}]   ;;  %s897_s2 = inlined_call_operand.hbm [shape: f32[128,128], index: 2, kind: input, shape index: {}]   ;;  %s898_s3 = inlined_call_operand.hbm [shape: f32[2,8,128], index: 3, kind: output, shape index: {}]  }
   0x1   :  { %9 = vsyncpa [#allocation4], 0 }
   0x2   :  { %11 = vsyncpa [#allocation4 + $0x1], 0  ;;  %s742_s12 = smov 0   ;;  %s744_s13 = smov 0  }
   0x3   :  { %s746_s14 = smov 0   ;;  %s748_s15 = smov 0  }
   0x4   :  { %s750_s16 = smov 0   ;;  %s752_s17 = smov 0  }
   0x5 LB: > { %s435_s18 = sadd.s32 4294967295, %s711_s17   ;;  %s436_s19 = sadd.s32 4294967294, %s711_s17   ;;  %s711_s17 = sphi %s752_s17, %s17_s17   ;;  %s707_s16 = sphi %s750_s16, %s916_s16   ;;  %s703_s15 = sphi %s748_s15, %s915_s15   ;;  %s699_s14 = sphi %s746_s14, %s914_s14   ;;  %s695_s13 = sphi %s744_s13, %s913_s13   ;;  %s691_s12 = sphi %s742_s12, %s912_s12  }
   0x6   : > { %s26_s20 = sadd.s32 1, %s707_s16  ;;  %s113_s21 = sadd.s32 1, %s699_s14 }
   0x7   : > { %p27_p0 = scmp.ge.s32.totalorder %s26_s20, 2  ;;  %p123_p1 = scmp.ne.s32.totalorder %s699_s14, %s695_s13 }
   0x8   : > { %p124_p2 = scmp.eq.s32.totalorder %s435_s18, 1  ;;  %p129_p3 = scmp.ne.s32.totalorder %s695_s13, %s691_s12 }
   0x9   : > { %s918_s20 = smov (%p27_p0, %s26_s20), 0  ;;  %p130_p5 = scmp.eq.s32.totalorder %s436_s19, 1 }
   0xa   : > { %p782_p4 = por %p124_p2, %p123_p1  ;;  %s108_s23 = ssub.s32 %s707_s16, %s918_s20 }
   0xb   : > { %p437_p6 = scmp.ge.s32.totalorder %s711_s17, 1  ;;  %p111_p7 = scmp.eq.s32.totalorder %s108_s23, 0 }
   0xc   : > { %s903_s22 = scalar_select %p782_p4, 1, 0 }
   0xd   : > { %p789_p8 = por %p130_p5, %p129_p3  ;;  %p137_p9 = scmp.lt.s32.totalorder %s711_s17, 3 }
   0xe   : > { %s795_s25 = scalar_select %p111_p7, %s699_s14, %s113_s21  }
   0xf   : > { %s904_s24 = scalar_select %p789_p8, 1, 0 }
  0x10   : > { %p797_p10 = pnand %p437_p6, %p137_p9  ;;  %p801_p11 = scmp.eq.s32.totalorder %s435_s18, 0 }
  0x11   : > { %s713_s28 = smov [#allocation2]   ;;  %s601_s6 = scalar_lea.hbm %s897_s2, 2048 }
  0x12   : > { %s905_s26 = scalar_select %p797_p10, 1, 0 }
  0x13   : > { %s906_s27 = scalar_select %p801_p11, 1, 0 }
  0x14   : > { %p533_p12 = pneg %p797_p10  ;;  %s156_s29 = sshll.u32 %s713_s28, 4  ;;  %s157_s29 = int_to_ptr.vmem [resolvable:$true] %s156_s29 }
  0x15   : > { %p602_p0 = scmp.ne.s32.totalorder %s897_s2, %s601_s6  ;;  %p608_p5 = scmp.lt.u32.totalorder %s601_s6, %s897_s2 }
  0x16   : > { %p809_p13 = pnand %p801_p11, %p533_p12 }
  0x18   : > { %p603_p1 = pneg %p809_p13 }
  0x1a   : > { %p604_p2 = pnand %p603_p1, %p602_p0 }
  0x1c   : > { %p605_p3 = pneg %p604_p2 }
  0x1e   : > { %p610_p6 = pnand %p608_p5, %p605_p3 }
  0x20   : > { %613 = shalt.err (!%p610_p6)
}
  0x21   : > { %s614_s11 = scalar_lea.vmem %s157_s29, 2048  ;;  %p622_p8 = scmp.lt.s32.totalorder %s157_s29, %s157_s29 }
  0x22   : > { %p615_p7 = scmp.ne.s32.totalorder %s157_s29, %s614_s11  ;;  %p623_p4 = scmp.lt.s32.totalorder %s614_s11, %s614_s11 }
  0x24   : > { %p617_p9 = pnand %p615_p7, %p603_p1  ;;  %p624_p11 = por %p623_p4, %p622_p8 }
  0x26   : > { %p618_p12 = pneg %p617_p9 }
  0x28   : > { %p625_p10 = pnand %p624_p11, %p618_p12 }
  0x2a   : > { %628 = shalt.err (!%p625_p10)
}
  0x2b   : > { %s714_s18 = smov 128   ;;  %s715_s19 = smov 8  }
  0x2c   : > { %536 = dma.hbm_to_vmem [thread:$0]  (!%p809_p13), %s897_s2, 2048, %s157_s29, [#allocation3], %s714_s18, %s714_s18, %s715_s19  }
  0x2d   : > { %p908_p0 = scmp.ne.s32.totalorder %s905_s26, 0 }
  0x2e   : > { %p909_p2 = scmp.ne.s32.totalorder (!%p908_p0), %s906_s27, 0 }
  0x2f   : > { %182 = sbr.rel (%p908_p0) target bundleno = 421 (0x1a5), region = 32 }
  0x36   : > { %682 = dma.done.wait (%p909_p2), [#allocation3], 2048  }
  0x37   : > { %684 = vsyncadd (%p909_p2), [#allocation3], 4294965248  ;;  %p212_p4 = scmp.lt.s32.totalorder %s703_s15, 1  ;;  %v716_v0 = vmov 0   ;;  %v717_v1 = vmov 0.0|0.0   ;;  %v232_v3 = vld [vmem:[#allocation2] sm:$0xff]  ;;  %v224_v28 = vlaneseq }
  0x38   : > { %600 = vset.pattern.permute.xlu0 %v716_v0  ;;  %503 = vmatprep.subr.bf16.mxu0 %v717_v1  ;;  %v233_v4 = vld [vmem:[#allocation2 + $0x8] sm:$0xff]  ;;  %v234_v6 = vld [vmem:[#allocation2 + $0x10] sm:$0xff]  ;;  %v235_v7 = vld [vmem:[#allocation2 + $0x18] sm:$0xff]  ;;  %vm718_vm0 = vmmov 0   ;;  %v719_v8 = vmov 0.0   ;;  %v720_v31 = vmov 1.0  }
  0x39   : > { %s213_s28 = scalar_select %p212_p4, %s703_s15, 1  ;;  %v504_v5 = vpack.c.bf16 %v233_v4, %v232_v3  ;;  %500 = vmatprep.mubr.msk.f32.mxu0 %vm718_vm0, %v719_v8  ;;  %v507_v9 = vpack.c.bf16 %v235_v7, %v234_v6  ;;  %v236_v10 = vld [vmem:[#allocation2 + $0x20] sm:$0xff]  ;;  %v237_v11 = vld [vmem:[#allocation2 + $0x28] sm:$0xff]  ;;  %v238_v13 = vld [vmem:[#allocation2 + $0x30] sm:$0xff]  ;;  %v225_v29 = vand.u32 127, %v224_v28 }
  0x3a   : > { %v510_v12 = vpack.c.bf16 %v237_v11, %v236_v10  ;;  %v239_v14 = vld [vmem:[#allocation2 + $0x38] sm:$0xff]  ;;  %v240_v16 = vld [vmem:[#allocation2 + $0x40] sm:$0xff]  ;;  %v241_v17 = vld [vmem:[#allocation2 + $0x48] sm:$0xff]  ;;  %s209_s27 = sand.u32 1, %s695_s13   ;;  %s448_s8 = sshll.u32 %s703_s15, 7 }
  0x3b   : > { %s444_s30 = sshll.u32 %s213_s28, 3  ;;  %505 = vmatpush3.bf16.msra.mxu0 %v504_v5  ;;  %v513_v15 = vpack.c.bf16 %v239_v14, %v238_v13  ;;  %v516_v18 = vpack.c.bf16 %v241_v17, %v240_v16  ;;  %v242_v19 = vld [vmem:[#allocation2 + $0x50] sm:$0xff]  ;;  %v243_v20 = vld [vmem:[#allocation2 + $0x58] sm:$0xff]  ;;  %v244_v22 = vld [vmem:[#allocation2 + $0x60] sm:$0xff]  ;;  %s443_s5 = sshll.u32 %s209_s27, 3 }
  0x3c   : > { %s218_s26 = scalar_lea.vmem %s895_s0, %s444_s30  ;;  %506 = vmatprep.subr.bf16.mxu0 %v717_v1  ;;  %v519_v21 = vpack.c.bf16 %v243_v20, %v242_v19  ;;  %v245_v23 = vld [vmem:[#allocation2 + $0x68] sm:$0xff]  ;;  %v246_v25 = vld [vmem:[#allocation2 + $0x70] sm:$0xff]  ;;  %v247_v26 = vld [vmem:[#allocation2 + $0x78] sm:$0xff]  ;;  %s211_s9 = scalar_lea.vmem [#allocation5], %s443_s5 }
  0x3d   : > { %v223_v2 = vld [vmem:[%s218_s26] sm:$0xff]  ;;  %v522_v24 = vpack.c.bf16 %v245_v23, %v244_v22  ;;  %v525_v27 = vpack.c.bf16 %v247_v26, %v246_v25  ;;  %s337_s10 = sshll.u32 %s211_s9, 4  ;;  %s848_s19 = scalar_lea.hbm %s898_s3, %s448_s8  ;;  %s850_s10 = int_to_ptr.vmem [resolvable:$true] %s337_s10 }
  0x3e   : > { %227 = vperm.xlu0 %600, %v223_v2   ;;  %v319_v33 = vld [vmem:[%s896_s1] sm:$0xff]  ;;  %s323_s21 = scalar_lea.sflag [#allocation4], %s209_s27  ;;  %s629_s23 = scalar_lea.vmem %s850_s10, 128 }
  0x3f   : > { %508 = vmatpush3.bf16.msra.mxu0 %v507_v9  ;;  %p630_p8 = scmp.ne.s32.totalorder %s850_s10, %s629_s23  ;;  %p910_p10 = scmp.ne.s32.totalorder %s903_s22, 0 }
  0x40   : > { %509 = vmatprep.subr.bf16.mxu0 %v717_v1  ;;  %s721_s15 = smov [#allocation5]  }
  0x41   : > { %p631_p11 = pnand %p630_p8, %p910_p10  ;;  %s633_s28 = sshll.u32 %s721_s15, 4  ;;  %s634_s28 = int_to_ptr.vmem [resolvable:$false] %s633_s28 }
  0x42   : > { %s635_s30 = scalar_lea.vmem %s634_s28, 256  ;;  %p636_p1 = scmp.lt.s32.totalorder %s850_s10, %s634_s28 }
  0x43   : > { %511 = vmatpush3.bf16.msra.mxu0 %v510_v12  ;;  %p632_p13 = pneg %p631_p11  ;;  %p637_p3 = scmp.lt.s32.totalorder %s635_s30, %s629_s23 }
  0x44   : > { %512 = vmatprep.subr.bf16.mxu0 %v717_v1 }
  0x45   : > { %p638_p5 = por %p637_p3, %p636_p1 }
  0x47   : > { %514 = vmatpush3.bf16.msra.mxu0 %v513_v15  ;;  %p639_p6 = pnand %p638_p5, %p632_p13 }
  0x48   : > { %515 = vmatprep.subr.bf16.mxu0 %v717_v1 }
  0x4b   : > { %517 = vmatpush3.bf16.msra.mxu0 %v516_v18 }
  0x4c   : > { %518 = vmatprep.subr.bf16.mxu0 %v717_v1 }
  0x4f   : > { %520 = vmatpush3.bf16.msra.mxu0 %v519_v21 }
  0x50   : > { %521 = vmatprep.subr.bf16.mxu0 %v717_v1 }
  0x53   : > { %523 = vmatpush3.bf16.msra.mxu0 %v522_v24 }
  0x54   : > { %524 = vmatprep.subr.bf16.mxu0 %v717_v1 }
  0x57   : > { %526 = vmatpush3.bf16.msra.mxu0 %v525_v27 }
  0xbd   : > { %v228_v30 = vpop.permute.xlu0 %227 }
  0xbe   : > { %vm229_vm1 = vcmp.eq.s32.totalorder %v225_v29, %v228_v30 }
  0xbf   : > { %501 = vmatmul.mubr.msk.f32.vlgmr.msra.gmra.mrb[0].mxu0 %vm229_vm1, %v720_v31 }
 0x192   : > { %v314_v32 = vpop.f32.mrb[0].mxu0 }
 0x193   : > { %v318_v34 = vmul.f32 11.313708, %v314_v32  ;;  %v502_v35 = vpop.f32.mrb[1].mxu0 }
 0x195   : > { %v320_v36 = vadd.f32 %v319_v33, %v318_v34 }
 0x197   : > { %321 = vst [vmem:[%s211_s9] sm:$0xff] %v320_v36 }
 0x198   : > { %642 = shalt.err (!%p639_p6)
}
 0x199   : > { %s643_s4 = scalar_lea.hbm %s848_s19, 128  ;;  %s647_s27 = scalar_lea.hbm %s898_s3, 256 }
 0x19a   : > { %p644_p7 = scmp.ne.s32.totalorder %s848_s19, %s643_s4  ;;  %p648_p0 = scmp.lt.u32.totalorder %s848_s19, %s898_s3 }
 0x19b   : > { %p649_p2 = scmp.lt.u32.totalorder %s647_s27, %s643_s4  ;;  %p651_p8 = scmp.lt.u32.totalorder %s643_s4, %s848_s19 }
 0x19c   : > { %p645_p9 = pnand %p644_p7, %p910_p10 }
 0x19d   : > { %p650_p4 = por %p649_p2, %p648_p0 }
 0x19e   : > { %p646_p12 = pneg %p645_p9 }
 0x19f   : > { %p652_p11 = por %p651_p8, %p650_p4 }
 0x1a1   : > { %p653_p13 = pnand %p652_p11, %p646_p12 }
 0x1a3   : > { %656 = shalt.err (!%p653_p13)
}
 0x1a4   : > { %531 = dma.vmem_to_hbm [thread:$0]  (%p910_p10), %s850_s10, 128, %s848_s19, %s323_s21  }
 0x1a5 PF: > { %p543_p1 = scmp.ge.s32.totalorder %s711_s17, 2  ;;  %s349_s7 = sand.u32 1, %s691_s12  }
 0x1a6   : > { %p911_p3 = scmp.ne.s32.totalorder %s904_s24, 0  ;;  %s350_s8 = scalar_lea.sflag [#allocation4], %s349_s7 }
 0x1a8   : > { %p538_p5 = pnand %p543_p1, %p911_p3 }
 0x1aa   : > { %686 = dma.done.wait (!%p538_p5), %s350_s8, 128  }
 0x1ab   : > { %688 = vsyncadd (!%p538_p5), %s350_s8, 4294967168  ;;  %s17_s17 = sadd.s32 1, %s711_s17   ;;  %s912_s12 = smov %s695_s13 }
 0x1ac   : > { %p14_p6 = scmp.ge.s32.totalorder %s17_s17, 4   ;;  %s913_s13 = smov %s699_s14 }
 0x1ad   : > { %s914_s14 = smov %s795_s25  ;;  %s915_s15 = smov %s707_s16 }
 0x1ae   : > { %s916_s16 = smov %s918_s20  ;;  %16 = sbr.rel (!%p14_p6) target bundleno = 5 (0x5), region = 75 }
 0x1b5   :  { %355 = vsyncpa [#allocation3], 1 }
 0x1b6   :  { %357 = vsyncpa [#allocation3 + $0x1], 1 }
 0x1b7   :  { %358 = vsyncpa [#allocation4], 1 }
 0x1b8   :  { %360 = vsyncpa [#allocation4 + $0x1], 1 }

</bundles_post_ra>
